<compile_context>
chip_gen: v5e
topology: v5e:2x2
jax: 0.10.0
libtpu: 0.0.40
codegen_flags: <defaults>
</compile_context>

<pallas_src>
import functools

import jax
import jax.numpy as jnp
from jax.experimental import pallas as pl
from jax.experimental.pallas import tpu as pltpu

N_TYPES = 4  # bonds, angles, nonbonds, dihedrals


def bandnn_kernel(x_ref, w1_ref, b1_ref, w2_ref, b2_ref, w3_ref, b3_ref,
                  w4_ref, out_ref, *, n_pad):
    """One batch tile: rows = b_tile * n_pad fused interaction rows."""
    x = x_ref[...]                                                   # (rows, d_in) bf16
    h = jnp.maximum(
        jnp.dot(x, w1_ref[...], preferred_element_type=jnp.float32) + b1_ref[...], 0.0)
    h = jnp.maximum(
        jnp.dot(h.astype(w2_ref.dtype), w2_ref[...],
                preferred_element_type=jnp.float32) + b2_ref[...], 0.0)
    h = jnp.maximum(
        jnp.dot(h.astype(w3_ref.dtype), w3_ref[...],
                preferred_element_type=jnp.float32) + b3_ref[...], 0.0)
    rows, d3 = h.shape
    b_tile = rows // n_pad
    # Per-molecule sum over the n_pad interaction rows (sublane reduction, XLU) ...
    h_mol = jnp.sum(h.reshape(b_tile, n_pad, d3), axis=1)            # (b_tile, d3) f32
    # ... then the width-1 final Linear as a VPU multiply + lane reduction.
    e = jnp.sum(h_mol * w4_ref[...], axis=-1)                        # (b_tile,)
    out_ref[...] = e.reshape(1, b_tile)                              # lane-dense store


def _mlp_zero_energy(p, matmul_dtype):
    """Per-type MLP applied to one all-zero row, replicating the kernel's precision
    (bf16 matmul operands, f32 accumulation).  Includes the final bias b4."""
    _, b1, w2, b2, w3, b3, w4, b4 = p
    h = jnp.maximum(b1, 0.0)                                         # 0 @ w1 is exactly 0
    h = jnp.maximum(jnp.dot(h.astype(matmul_dtype), w2.astype(matmul_dtype),
                            preferred_element_type=jnp.float32) + b2, 0.0)
    h = jnp.maximum(jnp.dot(h.astype(matmul_dtype), w3.astype(matmul_dtype),
                            preferred_element_type=jnp.float32) + b3, 0.0)
    return (h @ w4 + b4)[0, 0]


def bandnn_forward(inputs, params, *, target_rows=2048, matmul_dtype=jnp.bfloat16):
    """inputs: list of 4 arrays (B, N_t, F_t); params: list of 4 lists of 8 arrays
    (w1,b1,w2,b2,w3,b3,w4,b4 per type).  Returns (B, 1) total molecular energies."""
    assert len(inputs) == N_TYPES and len(params) == N_TYPES
    B = inputs[0].shape[0]
    hidden = params[0][0].shape[1]
    n_list = [int(x.shape[1]) for x in inputs]
    f_list = [int(x.shape[2]) for x in inputs]

    itemsize = jnp.dtype(matmul_dtype).itemsize
    # Per-type lane slot: next multiple of 8 >= max feature dim (don't waste lanes/HBM).
    slot = max(8, ((max(f_list) + 7) // 8) * 8)
    d_in = N_TYPES * slot
    d1, d2, d3 = 4 * hidden, 8 * hidden, 4 * hidden
    h = hidden

    # Rows per molecule, aligned to the sublane tile of the matmul dtype.
    row_align = 16 if itemsize < 4 else 8
    n_pad = max(row_align, ((max(n_list) + row_align - 1) // row_align) * row_align)

    # --- batch tile: big enough to amortize grid overhead, small enough for VMEM ---
    per_row_bytes = (d1 + d2 + d3) * 4 + 2 * d_in * itemsize  # f32 h's + 2x-buffered x
    rows_vmem_cap = max(n_pad, (24 << 20) // per_row_bytes)
    rows_cap = min(target_rows, rows_vmem_cap)
    b_tile = max(1, min(B, rows_cap // n_pad))
    # Keep >= 2 grid steps when the batch allows it (v7x: 2 TensorCores share the
    # "parallel" grid axis; a single mega-tile would serialize on one core).
    if b_tile == B and B >= 16:
        b_tile = (B + 1) // 2
    num_tiles = (B + b_tile - 1) // b_tile
    b_pad = num_tiles * b_tile
    rows_tile = b_tile * n_pad

    # ---- pack inputs: (b_pad * n_pad, d_in) bf16; type t in lanes [t*slot, t*slot+F_t) ----
    xf = jnp.zeros((b_pad, n_pad, d_in), matmul_dtype)
    for t, x in enumerate(inputs):
        xf = xf.at[:B, :n_list[t], t * slot:t * slot + f_list[t]].set(
            x.astype(matmul_dtype))
    xf = xf.reshape(b_pad * n_pad, d_in)

    # ---- block-diagonal weights (bf16) / fused bias rows (f32); off-diag blocks exact 0 ----
    w1f = jnp.zeros((d_in, d1), matmul_dtype)
    b1f = jnp.zeros((1, d1), jnp.float32)
    w2f = jnp.zeros((d1, d2), matmul_dtype)
    b2f = jnp.zeros((1, d2), jnp.float32)
    w3f = jnp.zeros((d2, d3), matmul_dtype)
    b3f = jnp.zeros((1, d3), jnp.float32)
    w4f = jnp.zeros((1, d3), jnp.float32)
    for t, p in enumerate(params):
        w1, b1, w2, b2, w3, b3, w4, b4 = p
        w1f = w1f.at[t * slot:t * slot + f_list[t], t * h:(t + 1) * h].set(
            w1.astype(matmul_dtype))
        b1f = b1f.at[:, t * h:(t + 1) * h].set(b1)
        w2f = w2f.at[t * h:(t + 1) * h, t * 2 * h:(t + 1) * 2 * h].set(
            w2.astype(matmul_dtype))
        b2f = b2f.at[:, t * 2 * h:(t + 1) * 2 * h].set(b2)
        w3f = w3f.at[t * 2 * h:(t + 1) * 2 * h, t * h:(t + 1) * h].set(
            w3.astype(matmul_dtype))
        b3f = b3f.at[:, t * h:(t + 1) * h].set(b3)
        w4f = w4f.at[0, t * h:(t + 1) * h].set(w4[:, 0])

    # ---- exact per-molecule constant (added in the wrapper, not in the kernel) ----
    # Kernel per-row energy excludes b4 and includes (n_pad - N_t) all-zero rows per type:
    #   TrueE = KernelE + sum_t [ n_pad * b4_t - (n_pad - N_t) * MLP_t(0) ]
    c_val = jnp.float32(0.0)
    for t, p in enumerate(params):
        b4 = p[7]
        c_val = c_val + n_pad * b4[0, 0] \
            - (n_pad - n_list[t]) * _mlp_zero_energy(p, matmul_dtype)

    # ---- VMEM budget: per-step live set with headroom, capped at 48 MiB (v7x-safe) ----
    weight_bytes = ((d_in * d1 + d1 * d2 + d2 * d3) * itemsize
                    + (d1 + d2 + d3 + d3) * 4)
    live_bytes = rows_tile * per_row_bytes + 2 * weight_bytes + 2 * num_tiles * b_tile * 4
    vmem_limit = int(min(max(32 << 20, 2 * live_bytes), 48 << 20))

    kernel = functools.partial(bandnn_kernel, n_pad=n_pad)
    # Grid-invariant blocks: constant index_map => fetched once, not re-DMA'd per step.
    resident = lambda arr: pl.BlockSpec(arr.shape, lambda i: (0, 0))

    out = pl.pallas_call(
        kernel,
        out_shape=jax.ShapeDtypeStruct((num_tiles, b_tile), jnp.float32),
        grid=(num_tiles,),
        in_specs=[
            pl.BlockSpec((rows_tile, d_in), lambda i: (i, 0)),        # fused bf16 inputs
            resident(w1f), resident(b1f), resident(w2f), resident(b2f),
            resident(w3f), resident(b3f), resident(w4f),
        ],
        out_specs=pl.BlockSpec((1, b_tile), lambda i: (i, 0)),        # lane-dense energies
        compiler_params=pltpu.CompilerParams(
            dimension_semantics=("parallel",),
            vmem_limit_bytes=vmem_limit),
    )(xf, w1f, b1f, w2f, b2f, w3f, b3f, w4f)

    energies = out.reshape(-1)[:B] + c_val                            # fold constant here
    return energies[:, None]                                          # (B, 1)


def init_mlp_params(key, in_dim, hidden):
    """Deterministic init matching torch.nn.Linear default U(-1/sqrt(fan_in), 1/sqrt(fan_in))."""
    dims = [(in_dim, hidden), (hidden, 2 * hidden), (2 * hidden, hidden), (hidden, 1)]
    params = []
    for din, dout in dims:
        key, kw, kb = jax.random.split(key, 3)
        bound = 1.0 / (din ** 0.5)
        w = jax.random.uniform(kw, (din, dout), jnp.float32, -bound, bound)
        b = jax.random.uniform(kb, (1, dout), jnp.float32, -bound, bound)
        params += [w, b]
    return params


def reference_forward(inputs, params, *, matmul_dtype=jnp.float32):
    """Pure-JAX reference replicating the PyTorch semantics (fixed N per type).
    With matmul_dtype=bf16 it mirrors the kernel's mixed-precision matmuls exactly."""
    total = 0.0
    for x, p in zip(inputs, params):
        w1, b1, w2, b2, w3, b3, w4, b4 = p
        hh = jnp.maximum(jnp.dot(x.astype(matmul_dtype), w1.astype(matmul_dtype),
                                 preferred_element_type=jnp.float32) + b1, 0.0)
        hh = jnp.maximum(jnp.dot(hh.astype(matmul_dtype), w2.astype(matmul_dtype),
                                 preferred_element_type=jnp.float32) + b2, 0.0)
        hh = jnp.maximum(jnp.dot(hh.astype(matmul_dtype), w3.astype(matmul_dtype),
                                 preferred_element_type=jnp.float32) + b3, 0.0)
        y = hh @ w4 + b4                     # (B, N_t, 1)
        total = total + jnp.sum(y, axis=(1, 2))
    return total[:, None]                    # (B, 1)


if __name__ == "__main__":
    key = jax.random.PRNGKey(0)
    B, hidden = 2, 32
    # (N_t, F_t) per interaction type — per-type counts differ to exercise padding.
    spec = {"bonds": (10, 6), "angles": (12, 7), "nonbonds": (16, 5), "dihedrals": (6, 9)}

    keys = jax.random.split(key, 2 * len(spec))
    inputs, params = [], []
    for i, (N, F) in enumerate(spec.values()):
        inputs.append(jax.random.normal(keys[i], (B, N, F), jnp.float32))
        params.append(init_mlp_params(keys[len(spec) + i], F, hidden))

    out = bandnn_forward(inputs, params)
    jax.block_until_ready(out)
    assert out.shape == (B, 1), out.shape

    # Exact-structure check: mixed-precision (bf16 operand) reference, tight tolerance.
    ref_mixed = reference_forward(inputs, params, matmul_dtype=jnp.bfloat16)
    assert jnp.allclose(out, ref_mixed, atol=2e-3, rtol=2e-3), (out, ref_mixed)

    # Module-semantics check: full-f32 reference, bf16-appropriate tolerance.
    ref_f32 = reference_forward(inputs, params, matmul_dtype=jnp.float32)
    assert jnp.allclose(out, ref_f32, atol=5e-2, rtol=5e-2), (out, ref_f32)

    print("KERNEL_OK")
</pallas_src>

<mosaic_0001>
module attributes {stable_mosaic.version = 11 : i64} {
  func.func @bandnn_kernel(%arg0: i32, %arg1: memref<32x64xbf16, #tpu.memory_space<vmem>>, %arg2: memref<64x128xbf16, #tpu.memory_space<vmem>>, %arg3: memref<1x128xf32, #tpu.memory_space<vmem>>, %arg4: memref<128x256xbf16, #tpu.memory_space<vmem>>, %arg5: memref<1x256xf32, #tpu.memory_space<vmem>>, %arg6: memref<256x128xbf16, #tpu.memory_space<vmem>>, %arg7: memref<1x128xf32, #tpu.memory_space<vmem>>, %arg8: memref<1x128xf32, #tpu.memory_space<vmem>>, %arg9: memref<1x2xf32, #tpu.memory_space<vmem>>) attributes {dimension_semantics = [#tpu.dimension_semantics<parallel>], iteration_bounds = array<i64: 1>, scalar_prefetch = 0 : i64, scratch_operands = 0 : i64, tpu.core_type = #tpu.core_type<tc>, window_params = [{transform_indices = @transform_0, window_bounds = array<i64: 32, 64>}, {pipeline_mode = #tpu.pipeline_mode<synchronous>, transform_indices = @transform_1, window_bounds = array<i64: 64, 128>}, {pipeline_mode = #tpu.pipeline_mode<synchronous>, transform_indices = @transform_2, window_bounds = array<i64: 1, 128>}, {pipeline_mode = #tpu.pipeline_mode<synchronous>, transform_indices = @transform_3, window_bounds = array<i64: 128, 256>}, {pipeline_mode = #tpu.pipeline_mode<synchronous>, transform_indices = @transform_4, window_bounds = array<i64: 1, 256>}, {pipeline_mode = #tpu.pipeline_mode<synchronous>, transform_indices = @transform_5, window_bounds = array<i64: 256, 128>}, {pipeline_mode = #tpu.pipeline_mode<synchronous>, transform_indices = @transform_6, window_bounds = array<i64: 1, 128>}, {pipeline_mode = #tpu.pipeline_mode<synchronous>, transform_indices = @transform_7, window_bounds = array<i64: 1, 128>}, {transform_indices = @transform_8, window_bounds = array<i64: 1, 2>}]} {
    %c0 = arith.constant 0 : index
    %c0_0 = arith.constant 0 : index
    %0 = vector.load %arg1[%c0, %c0_0] : memref<32x64xbf16, #tpu.memory_space<vmem>>, vector<32x64xbf16>
    %c0_1 = arith.constant 0 : index
    %c0_2 = arith.constant 0 : index
    %1 = vector.load %arg2[%c0_1, %c0_2] : memref<64x128xbf16, #tpu.memory_space<vmem>>, vector<64x128xbf16>
    %cst = arith.constant dense<0.000000e+00> : vector<32x128xf32>
    %2 = tpu.matmul %0, %1, %cst {dimension_numbers = #tpu.dot_dimension_numbers<[1], [0], [0], [1], [0, 0, 1, 1], [], []>} : vector<32x64xbf16>, vector<64x128xbf16>, vector<32x128xf32> -> vector<32x128xf32>
    %c0_3 = arith.constant 0 : index
    %c0_4 = arith.constant 0 : index
    %3 = vector.load %arg3[%c0_3, %c0_4] : memref<1x128xf32, #tpu.memory_space<vmem>>, vector<1x128xf32>
    %4 = vector.broadcast %3 : vector<1x128xf32> to vector<32x128xf32>
    %5 = arith.addf %2, %4 : vector<32x128xf32>
    %cst_5 = arith.constant 0.000000e+00 : f32
    %6 = vector.broadcast %cst_5 : f32 to vector<32x128xf32>
    %7 = arith.maximumf %5, %6 : vector<32x128xf32>
    %8 = arith.truncf %7 : vector<32x128xf32> to vector<32x128xbf16>
    %c0_6 = arith.constant 0 : index
    %c0_7 = arith.constant 0 : index
    %9 = vector.load %arg4[%c0_6, %c0_7] : memref<128x256xbf16, #tpu.memory_space<vmem>>, vector<128x256xbf16>
    %cst_8 = arith.constant dense<0.000000e+00> : vector<32x256xf32>
    %10 = tpu.matmul %8, %9, %cst_8 {dimension_numbers = #tpu.dot_dimension_numbers<[1], [0], [0], [1], [0, 0, 1, 1], [], []>} : vector<32x128xbf16>, vector<128x256xbf16>, vector<32x256xf32> -> vector<32x256xf32>
    %c0_9 = arith.constant 0 : index
    %c0_10 = arith.constant 0 : index
    %11 = vector.load %arg5[%c0_9, %c0_10] : memref<1x256xf32, #tpu.memory_space<vmem>>, vector<1x256xf32>
    %12 = vector.broadcast %11 : vector<1x256xf32> to vector<32x256xf32>
    %13 = arith.addf %10, %12 : vector<32x256xf32>
    %cst_11 = arith.constant 0.000000e+00 : f32
    %14 = vector.broadcast %cst_11 : f32 to vector<32x256xf32>
    %15 = arith.maximumf %13, %14 : vector<32x256xf32>
    %16 = arith.truncf %15 : vector<32x256xf32> to vector<32x256xbf16>
    %c0_12 = arith.constant 0 : index
    %c0_13 = arith.constant 0 : index
    %17 = vector.load %arg6[%c0_12, %c0_13] : memref<256x128xbf16, #tpu.memory_space<vmem>>, vector<256x128xbf16>
    %cst_14 = arith.constant dense<0.000000e+00> : vector<32x128xf32>
    %18 = tpu.matmul %16, %17, %cst_14 {dimension_numbers = #tpu.dot_dimension_numbers<[1], [0], [0], [1], [0, 0, 1, 1], [], []>} : vector<32x256xbf16>, vector<256x128xbf16>, vector<32x128xf32> -> vector<32x128xf32>
    %c0_15 = arith.constant 0 : index
    %c0_16 = arith.constant 0 : index
    %19 = vector.load %arg7[%c0_15, %c0_16] : memref<1x128xf32, #tpu.memory_space<vmem>>, vector<1x128xf32>
    %20 = vector.broadcast %19 : vector<1x128xf32> to vector<32x128xf32>
    %21 = arith.addf %18, %20 : vector<32x128xf32>
    %cst_17 = arith.constant 0.000000e+00 : f32
    %22 = vector.broadcast %cst_17 : f32 to vector<32x128xf32>
    %23 = arith.maximumf %21, %22 : vector<32x128xf32>
    %24 = vector.shape_cast %23 : vector<32x128xf32> to vector<2x16x128xf32>
    %cst_18 = arith.constant dense<0.000000e+00> : vector<2x128xf32>
    %25 = vector.multi_reduction <add>, %24, %cst_18 [1] : vector<2x16x128xf32> to vector<2x128xf32>
    %c0_19 = arith.constant 0 : index
    %c0_20 = arith.constant 0 : index
    %26 = vector.load %arg8[%c0_19, %c0_20] : memref<1x128xf32, #tpu.memory_space<vmem>>, vector<1x128xf32>
    %27 = vector.broadcast %26 : vector<1x128xf32> to vector<2x128xf32>
    %28 = arith.mulf %25, %27 : vector<2x128xf32>
    %cst_21 = arith.constant dense<0.000000e+00> : vector<2xf32>
    %29 = vector.multi_reduction <add>, %28, %cst_21 [1] : vector<2x128xf32> to vector<2xf32>
    %30 = vector.shape_cast %29 : vector<2xf32> to vector<1x2xf32>
    %c0_22 = arith.constant 0 : index
    %c0_23 = arith.constant 0 : index
    %31 = vector.load %arg9[%c0_22, %c0_23] : memref<1x2xf32, #tpu.memory_space<vmem>>, vector<1x2xf32>
    tpu.vector_store %arg9[%c0_22, %c0_23], %30 {strides = array<i32>} : memref<1x2xf32, #tpu.memory_space<vmem>>, vector<1x2xf32>,
    return
  }
  func.func @transform_0(%arg0: i32) -> (i32, i32) {
    %c0_i32 = arith.constant 0 : i32
    %c0_i32_0 = arith.constant 0 : i32
    return %arg0, %c0_i32 : i32, i32
  }
  func.func @transform_1(%arg0: i32) -> (i32, i32) {
    %c0_i32 = arith.constant 0 : i32
    %c0_i32_0 = arith.constant 0 : i32
    %c0_i32_1 = arith.constant 0 : i32
    return %c0_i32, %c0_i32_0 : i32, i32
  }
  func.func @transform_2(%arg0: i32) -> (i32, i32) {
    %c0_i32 = arith.constant 0 : i32
    %c0_i32_0 = arith.constant 0 : i32
    %c0_i32_1 = arith.constant 0 : i32
    return %c0_i32, %c0_i32_0 : i32, i32
  }
  func.func @transform_3(%arg0: i32) -> (i32, i32) {
    %c0_i32 = arith.constant 0 : i32
    %c0_i32_0 = arith.constant 0 : i32
    %c0_i32_1 = arith.constant 0 : i32
    return %c0_i32, %c0_i32_0 : i32, i32
  }
  func.func @transform_4(%arg0: i32) -> (i32, i32) {
    %c0_i32 = arith.constant 0 : i32
    %c0_i32_0 = arith.constant 0 : i32
    %c0_i32_1 = arith.constant 0 : i32
    return %c0_i32, %c0_i32_0 : i32, i32
  }
  func.func @transform_5(%arg0: i32) -> (i32, i32) {
    %c0_i32 = arith.constant 0 : i32
    %c0_i32_0 = arith.constant 0 : i32
    %c0_i32_1 = arith.constant 0 : i32
    return %c0_i32, %c0_i32_0 : i32, i32
  }
  func.func @transform_6(%arg0: i32) -> (i32, i32) {
    %c0_i32 = arith.constant 0 : i32
    %c0_i32_0 = arith.constant 0 : i32
    %c0_i32_1 = arith.constant 0 : i32
    return %c0_i32, %c0_i32_0 : i32, i32
  }
  func.func @transform_7(%arg0: i32) -> (i32, i32) {
    %c0_i32 = arith.constant 0 : i32
    %c0_i32_0 = arith.constant 0 : i32
    %c0_i32_1 = arith.constant 0 : i32
    return %c0_i32, %c0_i32_0 : i32, i32
  }
  func.func @transform_8(%arg0: i32) -> (i32, i32) {
    %c0_i32 = arith.constant 0 : i32
    %c0_i32_0 = arith.constant 0 : i32
    return %arg0, %c0_i32 : i32, i32
  }
}

</mosaic_0001>

<bundles_post_ra>
// kernel: tpu_custom_call.1
= control target key start
LH: loop header
LB: loop body
LE: loop exit
PB: predicated region body
PF: predicated region fallthrough
CT: control target
= control target key end

     0   :  { %13 = vsyncpa [#allocation3], 0  ;;  %s971_s0 = inlined_call_operand.hbm [shape: bf16[32,64], index: 0, kind: input, shape index: {}]   ;;  %s972_s1 = inlined_call_operand.hbm [shape: bf16[64,128], index: 1, kind: input, shape index: {}]   ;;  %s973_s2 = inlined_call_operand.vmem [shape: f32[1,128], index: 2, kind: input, shape index: {}]   ;;  %s974_s3 = inlined_call_operand.hbm [shape: bf16[128,256], index: 3, kind: input, shape index: {}]   ;;  %s975_s4 = inlined_call_operand.vmem [shape: f32[1,256], index: 4, kind: input, shape index: {}]   ;;  %s976_s5 = inlined_call_operand.hbm [shape: bf16[256,128], index: 5, kind: input, shape index: {}]   ;;  %s977_s6 = inlined_call_operand.vmem [shape: f32[1,128], index: 6, kind: input, shape index: {}]   ;;  %s978_s7 = inlined_call_operand.vmem [shape: f32[1,128], index: 7, kind: input, shape index: {}]   ;;  %s979_s8 = inlined_call_operand.hbm [shape: f32[1,2], index: 8, kind: output, shape index: {}]  }
   0x1   :  { %14 = vsyncpa [#allocation6], 0 }
   0x2   :  { %15 = vsyncpa [#allocation9], 0 }
   0x3   :  { %16 = vsyncpa [#allocation4], 0  ;;  %s34_s29 = sshll.u32 %s972_s1, 4  ;;  %s890_s30 = smov [#allocation5]   ;;  %s35_s29 = int_to_ptr.hbm [resolvable:$true] %s34_s29 }
   0x4   :  { %s36_s9 = sshll.u32 %s890_s30, 4  ;;  %s21_s12 = sshll.u32 %s971_s0, 4  ;;  %s37_s9 = int_to_ptr.vmem [resolvable:$true] %s36_s9  ;;  %s22_s12 = int_to_ptr.hbm [resolvable:$true] %s21_s12 }
   0x5   :  { %s891_s13 = smov 64   ;;  %s892_s14 = smov 4  }
   0x6   :  { %42 = dma.hbm_to_vmem [thread:$0]  %s35_s29, 512, %s37_s9, [#allocation6], %s891_s13, %s891_s13, %s892_s14  }
   0x7   :  { %s893_s15 = smov [#allocation2]   ;;  %s49_s19 = sshll.u32 %s974_s3, 4  ;;  %s50_s19 = int_to_ptr.hbm [resolvable:$true] %s49_s19 }
   0x8   :  { %s23_s16 = sshll.u32 %s893_s15, 4  ;;  %s894_s1 = smov [#allocation7]   ;;  %s24_s16 = int_to_ptr.vmem [resolvable:$true] %s23_s16 }
   0x9   :  { %29 = dma.hbm_to_vmem [thread:$0]  %s22_s12, 256, %s24_s16, [#allocation3], %s891_s13, %s891_s13, %s892_s14  }
   0xa   :  { %s51_s20 = sshll.u32 %s894_s1, 4  ;;  %s64_s0 = sshll.u32 %s976_s5, 4  ;;  %s52_s20 = int_to_ptr.vmem [resolvable:$true] %s51_s20  ;;  %s65_s0 = int_to_ptr.hbm [resolvable:$true] %s64_s0 }
   0xb   :  { %s895_s23 = smov 128   ;;  %s896_s24 = smov 8  }
   0xc   :  { %57 = dma.hbm_to_vmem [thread:$0]  %s50_s19, 2048, %s52_s20, [#allocation6], %s895_s23, %s895_s23, %s896_s24  }
   0xd   :  { %s897_s25 = smov [#allocation8]  }
   0xe   :  { %s66_s26 = sshll.u32 %s897_s25, 4  ;;  %s67_s26 = int_to_ptr.vmem [resolvable:$true] %s66_s26 }
   0xf   :  { %72 = dma.hbm_to_vmem [thread:$0]  %s65_s0, 2048, %s67_s26, [#allocation9], %s891_s13, %s891_s13, %s892_s14  }
  0x10   :  { %882 = dma.done.wait [#allocation3], 256  }
  0x11   :  { %883 = vsyncadd [#allocation3], 4294967040 }
  0x12   :  { %884 = dma.done.wait [#allocation6], 2560  }
  0x13   :  { %885 = vsyncadd [#allocation6], 4294964736 }
  0x14   :  { %886 = dma.done.wait [#allocation9], 2048  }
  0x15   :  { %887 = vsyncadd [#allocation9], 4294965248  ;;  %v717_v0 = vld [vmem:[#allocation5 + $0x18] sm:$0xff]  ;;  %v716_v1 = vld [vmem:[#allocation5 + $0x10] sm:$0xff]  ;;  %vm144_vm0 = vcmask 523264   ;;  %vm525_vm1 = vcmask 1041409  }
  0x16   :  { %155 = vmatpush.bf16.msra.mxu0 %v717_v0  ;;  %v642_v2 = vld [vmem:[#allocation7 + $0x70] sm:$0xf]  ;;  %v733_v3 = vld [vmem:[#allocation7 + $0x74] sm:$0xf0]  ;;  %v732_v4 = vld [vmem:[#allocation7 + $0x74] sm:$0xf] }
  0x17   :  { %v643_v5 = vor.u32 %v733_v3, %v642_v2  ;;  %v644_v6 = vld [vmem:[#allocation7 + $0x78] sm:$0xf0]  ;;  %v634_v7 = vld [vmem:[#allocation7 + $0x60] sm:$0xf]  ;;  %v731_v8 = vld [vmem:[#allocation7 + $0x64] sm:$0xf0] }
  0x18   :  { %v647_v9 = vor.u32 %v732_v4, %v644_v6  ;;  %v730_v10 = vld [vmem:[#allocation7 + $0x64] sm:$0xf]  ;;  %v636_v11 = vld [vmem:[#allocation7 + $0x68] sm:$0xf0]  ;;  %v635_v12 = vor.u32 %v731_v8, %v634_v7  ;;  %v626_v15 = vld [vmem:[#allocation7 + $0x50] sm:$0xf] }
  0x19   :  { %278 = vmatpush.bf16.msra.mxu1 %v643_v5  ;;  %v715_v13 = vld [vmem:[#allocation5 + $0x8] sm:$0xff]  ;;  %v639_v14 = vor.u32 %v730_v10, %v636_v11  ;;  %v729_v16 = vld [vmem:[#allocation7 + $0x54] sm:$0xf0]  ;;  %v728_v17 = vld [vmem:[#allocation7 + $0x54] sm:$0xf]  ;;  %vm528_vm2 = vcmask 1041408  }
  0x1a   :  { %156 = vmatpush.bf16.msra.mxu0 %v716_v1  ;;  %297 = vmatpush.bf16.msra.mxu2 %v647_v9  ;;  %v628_v18 = vld [vmem:[#allocation7 + $0x58] sm:$0xf0]  ;;  %v627_v19 = vor.u32 %v729_v16, %v626_v15  ;;  %v714_v20 = vld [vmem:[#allocation5] sm:$0xff]  ;;  %v727_v23 = vld [vmem:[#allocation7 + $0x44] sm:$0xf0]  ;;  %s898_s30 = smov [#allocation10]  }
  0x1b   :  { %v631_v21 = vor.u32 %v728_v17, %v628_v18  ;;  %v618_v22 = vld [vmem:[#allocation7 + $0x40] sm:$0xf]  ;;  %v726_v24 = vld [vmem:[#allocation7 + $0x44] sm:$0xf]  ;;  %v620_v25 = vld [vmem:[#allocation7 + $0x48] sm:$0xf0] }
  0x1c   :  { %v712_v26 = vld [vmem:[#allocation2] sm:$0xff]  ;;  %v619_v27 = vor.u32 %v727_v23, %v618_v22  ;;  %v623_v28 = vor.u32 %v726_v24, %v620_v25  ;;  %v713_v29 = vld [vmem:[#allocation2 + $0x8] sm:$0xff]  ;;  %v602_v36 = vld [vmem:[#allocation7 + $0x20] sm:$0xf]  ;;  %s544_s9 = sshll.u32 %s898_s30, 4  ;;  %s546_s12 = sshll.u32 %s979_s8, 4  ;;  %s545_s9 = int_to_ptr.vmem [resolvable:$true] %s544_s9  ;;  %s547_s12 = int_to_ptr.hbm [resolvable:$true] %s546_s12 }
  0x1d   :  { %279 = vmatpush.bf16.msra.mxu1 %v635_v12  ;;  %v610_v30 = vld [vmem:[#allocation7 + $0x30] sm:$0xf]  ;;  %v725_v31 = vld [vmem:[#allocation7 + $0x34] sm:$0xf0]  ;;  %v724_v32 = vld [vmem:[#allocation7 + $0x34] sm:$0xf] }
  0x1e   :  { %157 = vmatpush.bf16.msra.mxu0 %v715_v13  ;;  %298 = vmatpush.bf16.msra.mxu2 %v639_v14  ;;  %v611_v33 = vor.u32 %v725_v31, %v610_v30  ;;  %v612_v34 = vld [vmem:[#allocation7 + $0x38] sm:$0xf0]  ;;  %v723_v37 = vld [vmem:[#allocation7 + $0x24] sm:$0xf0]  ;;  %v722_v38 = vld [vmem:[#allocation7 + $0x24] sm:$0xf] }
  0x1f   :  { %v615_v35 = vor.u32 %v724_v32, %v612_v34  ;;  %v603_v39 = vor.u32 %v723_v37, %v602_v36  ;;  %v604_v40 = vld [vmem:[#allocation7 + $0x28] sm:$0xf0]  ;;  %v594_v42 = vld [vmem:[#allocation7 + $0x10] sm:$0xf]  ;;  %v721_v43 = vld [vmem:[#allocation7 + $0x14] sm:$0xf0] }
  0x20   :  { %v607_v41 = vor.u32 %v722_v38, %v604_v40  ;;  %v720_v44 = vld [vmem:[#allocation7 + $0x14] sm:$0xf]  ;;  %v595_v45 = vor.u32 %v721_v43, %v594_v42  ;;  %v596_v46 = vld [vmem:[#allocation7 + $0x18] sm:$0xf0]  ;;  %v586_v48 = vld [vmem:[#allocation7] sm:$0xf] }
  0x21   :  { %280 = vmatpush.bf16.msra.mxu1 %v627_v19  ;;  %v599_v47 = vor.u32 %v720_v44, %v596_v46  ;;  %v719_v49 = vld [vmem:[#allocation7 + $0x4] sm:$0xf0]  ;;  %v718_v50 = vld [vmem:[#allocation7 + $0x4] sm:$0xf]  ;;  %v588_v52 = vld [vmem:[#allocation7 + $0x8] sm:$0xf0] }
  0x22   :  { %158 = vmatpush.bf16.msra.mxu0 %v714_v20  ;;  %299 = vmatpush.bf16.msra.mxu2 %v631_v21  ;;  %v587_v51 = vor.u32 %v719_v49, %v586_v48  ;;  %v591_v53 = vor.u32 %v718_v50, %v588_v52  ;;  %v741_v54 = vld [vmem:[#allocation8 + $0x38] sm:$0xff]  ;;  %v740_v57 = vld [vmem:[#allocation8 + $0x30] sm:$0xff]  ;;  %v739_v60 = vld [vmem:[#allocation8 + $0x28] sm:$0xff]  ;;  %vm537_vm3 = vcmask 8192  }
  0x23   :  { %v749_v55 = vld [vmem:[#allocation8 + $0x78] sm:$0xff]  ;;  %460 = vmatpush.bf16.msra.mxu3 %v741_v54  ;;  %v748_v58 = vld [vmem:[#allocation8 + $0x70] sm:$0xff]  ;;  %v747_v61 = vld [vmem:[#allocation8 + $0x68] sm:$0xff] }
  0x24   :  { %v759_v59 = vld [vmem:[%s973_s2] ss:$0 sm:$0xff]  ;;  %v738_v1 = vld [vmem:[#allocation8 + $0x20] sm:$0xff]  ;;  %v737_v12 = vld [vmem:[#allocation8 + $0x18] sm:$0xff] }
  0x25   :  { %582 = vmatmul.msk.bf16.vlgmr.msra.gmra.mxu0 %vm144_vm0, %v712_v26  ;;  %281 = vmatpush.bf16.msra.mxu1 %v619_v27  ;;  %v746_v13 = vld [vmem:[#allocation8 + $0x60] sm:$0xff]  ;;  %v736_v14 = vld [vmem:[#allocation8 + $0x10] sm:$0xff]  ;;  %v745_v15 = vld [vmem:[#allocation8 + $0x58] sm:$0xff] }
  0x26   :  { %300 = vmatpush.bf16.msra.mxu2 %v623_v28  ;;  %479 = vmatpush.bf16.msrb.mxu0 %v749_v55  ;;  %v735_v16 = vld [vmem:[#allocation8 + $0x8] sm:$0xff]  ;;  %v744_v17 = vld [vmem:[#allocation8 + $0x50] sm:$0xff]  ;;  %v734_v18 = vld [vmem:[#allocation8] sm:$0xff] }
  0x27   :  { %461 = vmatpush.bf16.msra.mxu3 %v740_v57  ;;  %v743_v19 = vld [vmem:[#allocation8 + $0x48] sm:$0xff]  ;;  %v742_v20 = vld [vmem:[#allocation8 + $0x40] sm:$0xff]  ;;  %v192_v21 = vld [vmem:[%s975_s4] sm:$0x3] }
  0x28   :  { %v194_v23 = vperm.slane %v192_v21, 0  ;;  %v195_v27 = vperm.slane %v192_v21, 1  ;;  %v760_v54 = vld [vmem:[%s977_s6] ss:$0 sm:$0xff] }
  0x29   :  { %282 = vmatpush.bf16.msra.mxu1 %v611_v33 }
  0x2a   :  { %301 = vmatpush.bf16.msra.mxu2 %v615_v35  ;;  %480 = vmatpush.bf16.msrb.mxu0 %v748_v58 }
  0x2b   :  { %462 = vmatpush.bf16.msra.mxu3 %v739_v60 }
  0x2d   :  { %283 = vmatpush.bf16.msra.mxu1 %v603_v39 }
  0x2e   :  { %302 = vmatpush.bf16.msra.mxu2 %v607_v41  ;;  %481 = vmatpush.bf16.msrb.mxu0 %v747_v61 }
  0x2f   :  { %463 = vmatpush.bf16.msra.mxu3 %v738_v1 }
  0x31   :  { %284 = vmatpush.bf16.msra.mxu1 %v595_v45 }
  0x32   :  { %303 = vmatpush.bf16.msra.mxu2 %v599_v47  ;;  %482 = vmatpush.bf16.msrb.mxu0 %v746_v13 }
  0x33   :  { %464 = vmatpush.bf16.msra.mxu3 %v737_v12 }
  0x35   :  { %583 = vmatmul.msk.bf16.gmra.mxu0 %vm144_vm0, %v713_v29  ;;  %285 = vmatpush.bf16.msra.mxu1 %v587_v51 }
  0x36   :  { %304 = vmatpush.bf16.msra.mxu2 %v591_v53  ;;  %483 = vmatpush.bf16.msrb.mxu0 %v745_v15 }
  0x37   :  { %465 = vmatpush.bf16.msra.mxu3 %v736_v14 }
  0x3a   :  { %484 = vmatpush.bf16.msrb.mxu0 %v744_v17 }
  0x3b   :  { %466 = vmatpush.bf16.msra.mxu3 %v735_v16 }
  0x3e   :  { %485 = vmatpush.bf16.msrb.mxu0 %v743_v19 }
  0x3f   :  { %467 = vmatpush.bf16.msra.mxu3 %v734_v18 }
  0x42   :  { %486 = vmatpush.bf16.msrb.mxu0 %v742_v20 }
  0xa2   :  { %v160_v56 = vpop.f32.mrf.mxu0 }
  0xa3   :  { %v161_v62 = vadd.f32 %v759_v59, %v160_v56 }
  0xa5   :  { %v170_v2 = vmax.f32 %v161_v62, 0.0 }
  0xaa   :  { %v162_v63 = vpop.f32.mrf.mxu0 }
  0xab   :  { %v163_v0 = vadd.f32 %v759_v59, %v162_v63 }
  0xad   :  { %v171_v3 = vmax.f32 %v163_v0, 0.0 }
  0xaf   :  { %v174_v4 = vpack.c.bf16 %v171_v3, %v170_v2 }
  0xb1   :  { %286 = vmatmul.bf16.vlgmr.msra.gmra.mxu1 %v174_v4  ;;  %305 = vmatmul.bf16.vlgmr.msra.gmra.mxu2 %v174_v4 }
  0xb2   :  { %v165_v5 = vpop.f32.mrf.mxu0 }
  0xb3   :  { %v166_v6 = vadd.f32 %v759_v59, %v165_v5 }
  0xb5   :  { %v172_v9 = vmax.f32 %v166_v6, 0.0 }
  0xba   :  { %v167_v7 = vpop.f32.mrf.mxu0 }
  0xbb   :  { %v168_v8 = vadd.f32 %v759_v59, %v167_v7 }
  0xbd   :  { %v173_v10 = vmax.f32 %v168_v8, 0.0 }
  0xbf   :  { %v175_v11 = vpack.c.bf16 %v173_v10, %v172_v9 }
  0xc1   :  { %291 = vmatmul.bf16.gmra.mxu1 %v175_v11  ;;  %310 = vmatmul.bf16.gmra.mxu2 %v175_v11 }
 0x12e   :  { %v287_v22 = vpop.f32.mrf.mxu1 }
 0x12f   :  { %v288_v25 = vadd.f32 %v287_v22, %v194_v23 }
 0x131   :  { %v316_v29 = vmax.f32 %v288_v25, 0.0 }
 0x134   :  { %v306_v24 = vpop.f32.mrf.mxu2 }
 0x135   :  { %v307_v31 = vadd.f32 %v306_v24, %v195_v27 }
 0x136   :  { %v289_v26 = vpop.f32.mrf.mxu1 }
 0x137   :  { %v290_v28 = vadd.f32 %v289_v26, %v194_v23  ;;  %v317_v36 = vmax.f32 %v307_v31, 0.0 }
 0x139   :  { %v318_v30 = vmax.f32 %v290_v28, 0.0 }
 0x13b   :  { %v324_v32 = vpack.c.bf16 %v318_v30, %v316_v29  ;;  %v533_v29 = vlaneseq }
 0x13c   :  { %v308_v33 = vpop.f32.mrf.mxu2 }
 0x13d   :  { %v309_v34 = vadd.f32 %v308_v33, %v195_v27  ;;  %468 = vmatmul.bf16.vlgmr.msra.gmra.mxu3 %v324_v32  ;;  %v534_v30 = vand.u32 127, %v533_v29 }
 0x13e   :  { %v292_v35 = vpop.f32.mrf.mxu1 }
 0x13f   :  { %v319_v37 = vmax.f32 %v309_v34, 0.0  ;;  %v293_v40 = vadd.f32 %v292_v35, %v194_v23 }
 0x141   :  { %v325_v38 = vpack.c.bf16 %v319_v37, %v317_v36  ;;  %v320_v43 = vmax.f32 %v293_v40, 0.0 }
 0x143   :  { %487 = vmatmul.bf16.vlgmr.msrb.gmra.mxu0 %v325_v38 }
 0x144   :  { %v311_v39 = vpop.f32.mrf.mxu2 }
 0x145   :  { %v312_v45 = vadd.f32 %v311_v39, %v195_v27 }
 0x146   :  { %v294_v41 = vpop.f32.mrf.mxu1 }
 0x147   :  { %v295_v42 = vadd.f32 %v294_v41, %v194_v23  ;;  %v321_v49 = vmax.f32 %v312_v45, 0.0  ;;  %v761_v23 = vld [vmem:[%s978_s7] ss:$0 sm:$0xff] }
 0x149   :  { %v322_v44 = vmax.f32 %v295_v42, 0.0 }
 0x14b   :  { %v326_v46 = vpack.c.bf16 %v322_v44, %v320_v43 }
 0x14c   :  { %v313_v47 = vpop.f32.mrf.mxu2 }
 0x14d   :  { %v314_v48 = vadd.f32 %v313_v47, %v195_v27  ;;  %473 = vmatmul.bf16.gmra.mxu3 %v326_v46 }
 0x14f   :  { %v323_v50 = vmax.f32 %v314_v48, 0.0 }
 0x151   :  { %v327_v51 = vpack.c.bf16 %v323_v50, %v321_v49 }
 0x153   :  { %492 = vmatmul.bf16.gmra.mxu0 %v327_v51 }
 0x1c0   :  { %v469_v52 = vpop.f32.mrf.mxu3  ;;  %v488_v53 = vpop.f32.mrf.mxu0 }
 0x1c1   :  { %v470_v57 = vadd.f32 %v760_v54, %v469_v52 }
 0x1c3   :  { %v489_v60 = vadd.f32 %v488_v53, %v470_v57 }
 0x1c5   :  { %v498_v0 = vmax.f32 %v489_v60, 0.0 }
 0x1c8   :  { %v471_v55 = vpop.f32.mrf.mxu3  ;;  %v490_v56 = vpop.f32.mrf.mxu0 }
 0x1c9   :  { %v472_v58 = vadd.f32 %v760_v54, %v471_v55 }
 0x1cb   :  { %v491_v59 = vadd.f32 %v490_v56, %v472_v58 }
 0x1cd   :  { %v499_v61 = vmax.f32 %v491_v59, 0.0 }
 0x1cf   :  { %v502_v1 = vadd.f32 %v499_v61, %v498_v0 }
 0x1d0   :  { %v474_v62 = vpop.f32.mrf.mxu3  ;;  %v493_v63 = vpop.f32.mrf.mxu0 }
 0x1d1   :  { %v475_v2 = vadd.f32 %v760_v54, %v474_v62  ;;  %v503_v3 = vrot.slane %v502_v1, 4 }
 0x1d3   :  { %v494_v5 = vadd.f32 %v493_v63, %v475_v2  ;;  %v504_v8 = vadd.f32 %v503_v3, %v502_v1 }
 0x1d5   :  { %v500_v10 = vmax.f32 %v494_v5, 0.0  ;;  %v505_v12 = vrot.slane %v504_v8, 2 }
 0x1d7   :  { %v506_v15 = vadd.f32 %v505_v12, %v504_v8 }
 0x1d8   :  { %v476_v4 = vpop.f32.mrf.mxu3  ;;  %v495_v7 = vpop.f32.mrf.mxu0 }
 0x1d9   :  { %v477_v6 = vadd.f32 %v760_v54, %v476_v4  ;;  %v507_v18 = vrot.slane %v506_v15, 1 }
 0x1db   :  { %v496_v9 = vadd.f32 %v495_v7, %v477_v6  ;;  %v508_v21 = vadd.f32 %v507_v18, %v506_v15 }
 0x1dd   :  { %v501_v11 = vmax.f32 %v496_v9, 0.0  ;;  %v520_v25 = vmul.f32 %v761_v23, %v508_v21 }
 0x1df   :  { %v509_v13 = vadd.f32 %v501_v11, %v500_v10 }
 0x1e1   :  { %v510_v14 = vrot.slane %v509_v13, 4 }
 0x1e3   :  { %v511_v16 = vadd.f32 %v510_v14, %v509_v13 }
 0x1e5   :  { %v512_v17 = vrot.slane %v511_v16, 2 }
 0x1e7   :  { %v513_v19 = vadd.f32 %v512_v17, %v511_v16 }
 0x1e9   :  { %v514_v20 = vrot.slane %v513_v19, 1 }
 0x1eb   :  { %v515_v22 = vadd.f32 %v514_v20, %v513_v19 }
 0x1ed   :  { %v521_v24 = vmul.f32 %v761_v23, %v515_v22 }
 0x1ef   :  { %v524_v26 = vrot.slane %v521_v24, 7 }
 0x1f1   :  { %v526_v27 = vsel %vm525_vm1, %v524_v26, %v520_v25 }
 0x1f2   :  { %v529_v28 = vsel %vm528_vm2, %v526_v27, 0.0 }
 0x1f3   :  { %530 = vadd.xlane.f32.xlu0 %v529_v28 }
 0x266   :  { %v531_v31 = vpop.xlane.xlu0 %530 }
 0x267   :  { %v535_v32 = vperm.slane %v531_v31, %v534_v30 }
 0x269   :  { %538 = vst.msk [vmem:[#allocation10] sm:$0x1] %vm537_vm3, %v535_v32 }
 0x26a   :  { %549 = dma.vmem_to_hbm [thread:$0]  %s545_s9, 16, %s547_s12, [#allocation4]  }
 0x26b   :  { %888 = dma.done.wait [#allocation4], 16  }
 0x26c   :  { %889 = vsyncadd [#allocation4], 4294967280 }
 0x26d   :  { %554 = vsyncpa [#allocation3], 1 }
 0x26e   :  { %555 = vsyncpa [#allocation6], 1 }
 0x26f   :  { %556 = vsyncpa [#allocation9], 1 }
 0x270   :  { %557 = vsyncpa [#allocation4], 1 }

</bundles_post_ra>
